<compile_context>
chip_gen: v5e
topology: v5e:2x2
jax: 0.10.0
libtpu: 0.0.40
codegen_flags: <defaults>
</compile_context>

<pallas_src>
import math

import jax
import jax.numpy as jnp
from jax.experimental import pallas as pl
from jax.experimental.pallas import tpu as pltpu


def make_attention_kernel(n_heads, hidden, hidden_attn, seq):
    NH, H, Ha, T = n_heads, hidden, hidden_attn, seq
    dh_a = Ha // NH   # per-head dim of q/k
    dh_v = H // NH    # per-head dim of v

    def kernel(q_ref, k_ref, v_ref, w_ref, bias_ref, out_ref):
        # Broadcast this batch's activations across the head axis ONCE (leading,
        # untiled dim -> cheap tile replication; no lane extracts anywhere).
        qx = jnp.broadcast_to(q_ref[...][None, :, :], (NH, T, H))
        kx = jnp.broadcast_to(k_ref[...][None, :, :], (NH, T, H))
        vx = jnp.broadcast_to(v_ref[...][None, :, :], (NH, T, H))

        # Head-major projections: one batched dot_general each (head = batch dim).
        # Static ref slices pick each projection's per-head weight block (free).
        qh = jnp.einsum('htd,hde->hte', qx, w_ref[:, :, :dh_a],
                        preferred_element_type=jnp.float32)              # (NH, T, dh_a)
        kh = jnp.einsum('htd,hde->hte', kx, w_ref[:, :, dh_a:2 * dh_a],
                        preferred_element_type=jnp.float32)              # (NH, T, dh_a)
        vh = jnp.einsum('htd,hde->hte', vx, w_ref[:, :, 2 * dh_a:],
                        preferred_element_type=jnp.float32)              # (NH, T, dh_v)

        # All heads' scores in ONE batched dot_general.  q rows already carry
        # mask_q / sqrt(H // n_heads) (folded in the wrapper).
        s = jnp.einsum('hqd,hkd->hqk', qh, kh,
                       preferred_element_type=jnp.float32)               # (NH, T, T)
        s = s + bias_ref[...]        # (1, 1, T) additive key mask, broadcasts over heads/rows

        # Explicit softmax: exp on EUP, reciprocal on EUP (approx), multiply on VPU.
        m = jnp.max(s, axis=-1, keepdims=True)
        e = jnp.exp(s - m)
        denom = jnp.sum(e, axis=-1, keepdims=True)
        p = e * pl.reciprocal(denom, approx=True)

        # All heads' PV in ONE batched dot_general; single head-major store.
        o = jnp.einsum('hqk,hkd->hqd', p, vh, preferred_element_type=jnp.float32)
        out_ref[...] = o.astype(out_ref.dtype)

    return kernel


def pack_head_major_weights(wq, wk, wv, n_heads):
    """One-time parameter packing: head-major (n_heads, H, 2*dh_a + dh_v), no zero padding.

    wq, wk: (H, Ha) pre-transposed (in, out); wv: (H, H)."""
    H, Ha = wq.shape
    Hv = wv.shape[1]
    dh_a = Ha // n_heads
    dh_v = Hv // n_heads
    wq_hm = wq.reshape(H, n_heads, dh_a).transpose(1, 0, 2)   # (NH, H, dh_a)
    wk_hm = wk.reshape(H, n_heads, dh_a).transpose(1, 0, 2)
    wv_hm = wv.reshape(H, n_heads, dh_v).transpose(1, 0, 2)   # (NH, H, dh_v)
    return jnp.concatenate([wq_hm, wk_hm, wv_hm], axis=-1)    # (NH, H, 2*dh_a + dh_v)


def attention_pallas(q, k, v, w_hm, mask_q, mask_attn, n_heads):
    """q, k, v: (B, T, H); w_hm: pack_head_major_weights(wq, wk, wv, n_heads);
    mask_q, mask_attn: (B, T) float (1.0 keep / 0.0 mask)."""
    B, T, H = q.shape
    NH = n_heads
    assert H % NH == 0, "hidden must be divisible by n_heads"
    dh_v = H // NH
    dh_a = (w_hm.shape[-1] - dh_v) // 2
    Ha = dh_a * NH
    assert w_hm.shape == (NH, H, 2 * dh_a + dh_v)
    assert T % 8 == 0, "T must be a multiple of the 8-row sublane tile"
    scale = 1.0 / math.sqrt(dh_v)

    # Host/XLA-side layout plumbing (fuses into existing ops; no extra kernel work):
    #   fold mask_q * scale into q rows, flatten (B, T, H) -> (B*T, H), build additive bias.
    qs = q.astype(jnp.float32) * (mask_q.astype(jnp.float32) * scale)[:, :, None]
    q2 = qs.reshape(B * T, H)
    k2 = k.astype(jnp.float32).reshape(B * T, H)
    v2 = v.astype(jnp.float32).reshape(B * T, H)
    neg_bias = (-10000.0 * (1.0 - mask_attn.astype(jnp.float32))).reshape(B, 1, T)

    kernel = make_attention_kernel(NH, H, Ha, T)

    flops = (2 * B * T * H * (2 * Ha + H)          # three projections
             + 2 * B * NH * T * T * dh_a           # QK^T
             + 2 * B * NH * T * T * dh_v)          # PV
    bytes_accessed = 4 * (3 * B * T * H + NH * H * (2 * dh_a + dh_v)
                          + B * T + B * NH * T * dh_v)

    out3 = pl.pallas_call(
        kernel,
        out_shape=jax.ShapeDtypeStruct((B * NH, T, dh_v), jnp.float32),
        grid_spec=pltpu.PrefetchScalarGridSpec(
            num_scalar_prefetch=0,
            grid=(B,),
            in_specs=[
                pl.BlockSpec((T, H), lambda b: (b, 0)),                       # scaled/masked q rows
                pl.BlockSpec((T, H), lambda b: (b, 0)),                       # k rows
                pl.BlockSpec((T, H), lambda b: (b, 0)),                       # v rows
                pl.BlockSpec((NH, H, 2 * dh_a + dh_v), lambda b: (0, 0, 0)),  # head-major weights (resident)
                pl.BlockSpec((1, 1, T), lambda b: (b, 0, 0)),                 # additive key bias
            ],
            out_specs=pl.BlockSpec((NH, T, dh_v), lambda b: (b, 0, 0)),
        ),
        compiler_params=pltpu.CompilerParams(
            dimension_semantics=("parallel",)),
        cost_estimate=pl.CostEstimate(flops=flops,
                                      transcendentals=B * NH * T * T,
                                      bytes_accessed=bytes_accessed),
    )(q2, k2, v2, w_hm, neg_bias)

    # Head-major (B, NH, T, dh_v) -> head-concat (B, T, H): wrapper-side layout plumbing.
    return out3.reshape(B, NH, T, dh_v).transpose(0, 2, 1, 3).reshape(B, T, H)


def attention_reference(q, k, v, wq, wk, wv, mask_q, mask_attn, n_heads):
    """Pure-JAX mirror of the PyTorch forward (vanilla branch, eval mode)."""
    B, T, H = q.shape
    dh_v = H // n_heads
    dh_a = wq.shape[1] // n_heads
    qp = (q @ wq).reshape(B, T, n_heads, dh_a).transpose(0, 2, 1, 3)
    kp = (k @ wk).reshape(B, T, n_heads, dh_a).transpose(0, 2, 1, 3)
    vp = (v @ wv).reshape(B, T, n_heads, dh_v).transpose(0, 2, 1, 3)
    qp = qp * mask_q[:, None, :, None].astype(jnp.float32)
    scores = jnp.einsum('bhtd,bhsd->bhts', qp, kp) / math.sqrt(dh_v)
    scores = scores - 10000.0 * (1.0 - mask_attn[:, None, None, :].astype(jnp.float32))
    attn = jax.nn.softmax(scores, axis=-1)
    out = jnp.einsum('bhts,bhsd->bhtd', attn, vp)
    return out.transpose(0, 2, 1, 3).reshape(B, T, H)


if __name__ == "__main__":
    B, T, H, Ha, NH = 2, 8, 32, 32, 4

    key = jax.random.PRNGKey(0)
    kq, kk, kv, kwq, kwk, kwv = jax.random.split(key, 6)

    q = jax.random.normal(kq, (B, T, H), dtype=jnp.float32)
    k = jax.random.normal(kk, (B, T, H), dtype=jnp.float32)
    v = jax.random.normal(kv, (B, T, H), dtype=jnp.float32)

    # deterministic "Linear" weights (pre-transposed: (in, out)), no bias (cfg.bias=False)
    wq = jax.random.normal(kwq, (H, Ha), dtype=jnp.float32) * (1.0 / math.sqrt(H))
    wk = jax.random.normal(kwk, (H, Ha), dtype=jnp.float32) * (1.0 / math.sqrt(H))
    wv = jax.random.normal(kwv, (H, H), dtype=jnp.float32) * (1.0 / math.sqrt(H))
    w_hm = pack_head_major_weights(wq, wk, wv, NH)   # one-time parameter setup

    # masks: last position of batch 1 masked out, everything else kept
    mask_q = jnp.ones((B, T), dtype=jnp.float32)
    mask_attn = jnp.ones((B, T), dtype=jnp.float32).at[1, T - 1].set(0.0)

    out = attention_pallas(q, k, v, w_hm, mask_q, mask_attn, NH)
    out = jax.block_until_ready(out)

    ref = attention_reference(q, k, v, wq, wk, wv, mask_q, mask_attn, NH)
    assert out.shape == (B, T, H)
    # tolerance relaxed slightly vs pure-f32 because the softmax denominator uses the
    # EUP approximate reciprocal (rel err ~2^-12); everything else is f32.
    assert jnp.allclose(out, ref, atol=2e-3, rtol=2e-3), "mismatch vs JAX reference"

    print("KERNEL_OK")
</pallas_src>

<mosaic_0001>
module attributes {stable_mosaic.version = 11 : i64} {
  func.func @kernel(%arg0: i32, %arg1: memref<8x32xf32, #tpu.memory_space<vmem>>, %arg2: memref<8x32xf32, #tpu.memory_space<vmem>>, %arg3: memref<8x32xf32, #tpu.memory_space<vmem>>, %arg4: memref<4x32x24xf32, #tpu.memory_space<vmem>>, %arg5: memref<1x1x8xf32, #tpu.memory_space<vmem>>, %arg6: memref<4x8x8xf32, #tpu.memory_space<vmem>>) attributes {dimension_semantics = [#tpu.dimension_semantics<parallel>], iteration_bounds = array<i64: 2>, scalar_prefetch = 0 : i64, scratch_operands = 0 : i64, tpu.core_type = #tpu.core_type<tc>, window_params = [{transform_indices = @transform_0, window_bounds = array<i64: 8, 32>}, {transform_indices = @transform_1, window_bounds = array<i64: 8, 32>}, {transform_indices = @transform_2, window_bounds = array<i64: 8, 32>}, {pipeline_mode = #tpu.pipeline_mode<synchronous>, transform_indices = @transform_3, window_bounds = array<i64: 4, 32, 24>}, {transform_indices = @transform_4, window_bounds = array<i64: 1, 1, 8>}, {transform_indices = @transform_5, window_bounds = array<i64: 4, 8, 8>}]} {
    %c0 = arith.constant 0 : index
    %c0_0 = arith.constant 0 : index
    %0 = vector.load %arg1[%c0, %c0_0] : memref<8x32xf32, #tpu.memory_space<vmem>>, vector<8x32xf32>
    %1 = vector.shape_cast %0 : vector<8x32xf32> to vector<1x8x32xf32>
    %2 = vector.shape_cast %1 : vector<1x8x32xf32> to vector<1x8x32xf32>
    %3 = vector.broadcast %2 : vector<1x8x32xf32> to vector<4x8x32xf32>
    %c0_1 = arith.constant 0 : index
    %c0_2 = arith.constant 0 : index
    %4 = vector.load %arg2[%c0_1, %c0_2] : memref<8x32xf32, #tpu.memory_space<vmem>>, vector<8x32xf32>
    %5 = vector.shape_cast %4 : vector<8x32xf32> to vector<1x8x32xf32>
    %6 = vector.shape_cast %5 : vector<1x8x32xf32> to vector<1x8x32xf32>
    %7 = vector.broadcast %6 : vector<1x8x32xf32> to vector<4x8x32xf32>
    %c0_3 = arith.constant 0 : index
    %c0_4 = arith.constant 0 : index
    %8 = vector.load %arg3[%c0_3, %c0_4] : memref<8x32xf32, #tpu.memory_space<vmem>>, vector<8x32xf32>
    %9 = vector.shape_cast %8 : vector<8x32xf32> to vector<1x8x32xf32>
    %10 = vector.shape_cast %9 : vector<1x8x32xf32> to vector<1x8x32xf32>
    %11 = vector.broadcast %10 : vector<1x8x32xf32> to vector<4x8x32xf32>
    %c0_5 = arith.constant 0 : index
    %c0_6 = arith.constant 0 : index
    %c0_7 = arith.constant 0 : index
    %12 = vector.load %arg4[%c0_5, %c0_6, %c0_7] : memref<4x32x24xf32, #tpu.memory_space<vmem>>, vector<4x32x8xf32>
    "tpu.trace_start"() <{level = 10 : i32, message = "htd,hde->hte"}> : () -> ()
    %cst = arith.constant dense<0.000000e+00> : vector<4x8x8xf32>
    %13 = tpu.matmul %3, %12, %cst {dimension_numbers = #tpu.dot_dimension_numbers<[2], [1], [1], [2], [0, 0, 0, 1, 1, 2], [0], [0]>} : vector<4x8x32xf32>, vector<4x32x8xf32>, vector<4x8x8xf32> -> vector<4x8x8xf32>
    "tpu.trace_stop"() : () -> ()
    %c0_8 = arith.constant 0 : index
    %c0_9 = arith.constant 0 : index
    %c8 = arith.constant 8 : index
    %14 = vector.load %arg4[%c0_8, %c0_9, %c8] : memref<4x32x24xf32, #tpu.memory_space<vmem>>, vector<4x32x8xf32>
    "tpu.trace_start"() <{level = 10 : i32, message = "htd,hde->hte"}> : () -> ()
    %cst_10 = arith.constant dense<0.000000e+00> : vector<4x8x8xf32>
    %15 = tpu.matmul %7, %14, %cst_10 {dimension_numbers = #tpu.dot_dimension_numbers<[2], [1], [1], [2], [0, 0, 0, 1, 1, 2], [0], [0]>} : vector<4x8x32xf32>, vector<4x32x8xf32>, vector<4x8x8xf32> -> vector<4x8x8xf32>
    "tpu.trace_stop"() : () -> ()
    %c0_11 = arith.constant 0 : index
    %c0_12 = arith.constant 0 : index
    %c16 = arith.constant 16 : index
    %16 = vector.load %arg4[%c0_11, %c0_12, %c16] : memref<4x32x24xf32, #tpu.memory_space<vmem>>, vector<4x32x8xf32>
    "tpu.trace_start"() <{level = 10 : i32, message = "htd,hde->hte"}> : () -> ()
    %cst_13 = arith.constant dense<0.000000e+00> : vector<4x8x8xf32>
    %17 = tpu.matmul %11, %16, %cst_13 {dimension_numbers = #tpu.dot_dimension_numbers<[2], [1], [1], [2], [0, 0, 0, 1, 1, 2], [0], [0]>} : vector<4x8x32xf32>, vector<4x32x8xf32>, vector<4x8x8xf32> -> vector<4x8x8xf32>
    "tpu.trace_stop"() : () -> ()
    "tpu.trace_start"() <{level = 10 : i32, message = "hqd,hkd->hqk"}> : () -> ()
    %cst_14 = arith.constant dense<0.000000e+00> : vector<4x8x8xf32>
    %18 = tpu.matmul %13, %15, %cst_14 {dimension_numbers = #tpu.dot_dimension_numbers<[2], [2], [1], [1], [0, 0, 0, 1, 1, 1], [0], [0]>} : vector<4x8x8xf32>, vector<4x8x8xf32>, vector<4x8x8xf32> -> vector<4x8x8xf32>
    "tpu.trace_stop"() : () -> ()
    %c0_15 = arith.constant 0 : index
    %c0_16 = arith.constant 0 : index
    %c0_17 = arith.constant 0 : index
    %19 = vector.load %arg5[%c0_15, %c0_16, %c0_17] : memref<1x1x8xf32, #tpu.memory_space<vmem>>, vector<1x1x8xf32>
    %20 = vector.broadcast %19 : vector<1x1x8xf32> to vector<4x8x8xf32>
    %21 = arith.addf %18, %20 : vector<4x8x8xf32>
    %cst_18 = arith.constant dense<0xFF800000> : vector<4x8xf32>
    %22 = vector.multi_reduction <maximumf>, %21, %cst_18 [2] : vector<4x8x8xf32> to vector<4x8xf32>
    %23 = vector.shape_cast %22 : vector<4x8xf32> to vector<4x8x1xf32>
    %24 = vector.broadcast %23 : vector<4x8x1xf32> to vector<4x8x8xf32>
    %25 = arith.subf %21, %24 : vector<4x8x8xf32>
    %26 = math.exp %25 : vector<4x8x8xf32>
    %cst_19 = arith.constant dense<0.000000e+00> : vector<4x8xf32>
    %27 = vector.multi_reduction <add>, %26, %cst_19 [2] : vector<4x8x8xf32> to vector<4x8xf32>
    %28 = vector.shape_cast %27 : vector<4x8xf32> to vector<4x8x1xf32>
    %29 = tpu.reciprocal %28 {approx = true} : vector<4x8x1xf32> -> vector<4x8x1xf32>
    %30 = vector.broadcast %29 : vector<4x8x1xf32> to vector<4x8x8xf32>
    %31 = arith.mulf %26, %30 : vector<4x8x8xf32>
    "tpu.trace_start"() <{level = 10 : i32, message = "hqk,hkd->hqd"}> : () -> ()
    %cst_20 = arith.constant dense<0.000000e+00> : vector<4x8x8xf32>
    %32 = tpu.matmul %31, %17, %cst_20 {dimension_numbers = #tpu.dot_dimension_numbers<[2], [1], [1], [2], [0, 0, 0, 1, 1, 2], [0], [0]>} : vector<4x8x8xf32>, vector<4x8x8xf32>, vector<4x8x8xf32> -> vector<4x8x8xf32>
    "tpu.trace_stop"() : () -> ()
    %c0_21 = arith.constant 0 : index
    %c0_22 = arith.constant 0 : index
    %c0_23 = arith.constant 0 : index
    %33 = vector.load %arg6[%c0_21, %c0_22, %c0_23] : memref<4x8x8xf32, #tpu.memory_space<vmem>>, vector<4x8x8xf32>
    tpu.vector_store %arg6[%c0_21, %c0_22, %c0_23], %32 {strides = array<i32>} : memref<4x8x8xf32, #tpu.memory_space<vmem>>, vector<4x8x8xf32>,
    return
  }
  func.func @transform_0(%arg0: i32) -> (i32, i32) {
    %c0_i32 = arith.constant 0 : i32
    %c0_i32_0 = arith.constant 0 : i32
    return %arg0, %c0_i32 : i32, i32
  }
  func.func @transform_1(%arg0: i32) -> (i32, i32) {
    %c0_i32 = arith.constant 0 : i32
    %c0_i32_0 = arith.constant 0 : i32
    return %arg0, %c0_i32 : i32, i32
  }
  func.func @transform_2(%arg0: i32) -> (i32, i32) {
    %c0_i32 = arith.constant 0 : i32
    %c0_i32_0 = arith.constant 0 : i32
    return %arg0, %c0_i32 : i32, i32
  }
  func.func @transform_3(%arg0: i32) -> (i32, i32, i32) {
    %c0_i32 = arith.constant 0 : i32
    %c0_i32_0 = arith.constant 0 : i32
    %c0_i32_1 = arith.constant 0 : i32
    %c0_i32_2 = arith.constant 0 : i32
    return %c0_i32, %c0_i32_0, %c0_i32_1 : i32, i32, i32
  }
  func.func @transform_4(%arg0: i32) -> (i32, i32, i32) {
    %c0_i32 = arith.constant 0 : i32
    %c0_i32_0 = arith.constant 0 : i32
    %c0_i32_1 = arith.constant 0 : i32
    return %arg0, %c0_i32, %c0_i32_0 : i32, i32, i32
  }
  func.func @transform_5(%arg0: i32) -> (i32, i32, i32) {
    %c0_i32 = arith.constant 0 : i32
    %c0_i32_0 = arith.constant 0 : i32
    %c0_i32_1 = arith.constant 0 : i32
    return %arg0, %c0_i32, %c0_i32_0 : i32, i32, i32
  }
}

</mosaic_0001>

<bundles_post_ra>
// kernel: tpu_custom_call.1
= control target key start
LH: loop header
LB: loop body
LE: loop exit
PB: predicated region body
PF: predicated region fallthrough
CT: control target
= control target key end

     0   :  { %10 = vsyncpa [#allocation3], 0  ;;  %s1529_s0 = inlined_call_operand.vmem [shape: f32[16,32], index: 0, kind: input, shape index: {}]   ;;  %s1530_s1 = inlined_call_operand.vmem [shape: f32[16,32], index: 1, kind: input, shape index: {}]   ;;  %s1531_s2 = inlined_call_operand.vmem [shape: f32[16,32], index: 2, kind: input, shape index: {}]   ;;  %s1532_s3 = inlined_call_operand.vmem [shape: f32[4,32,24], index: 3, kind: input, shape index: {}]   ;;  %s1533_s4 = inlined_call_operand.vmem [shape: f32[2,1,8], index: 4, kind: input, shape index: {}]   ;;  %s1534_s5 = inlined_call_operand.hbm [shape: f32[8,8,8], index: 5, kind: output, shape index: {}]  }
   0x1   :  { %12 = vsyncpa [#allocation3 + $0x1], 0  ;;  %s1334_s18 = smov 0   ;;  %s1336_s19 = smov 0  }
   0x2   :  { %s1338_s20 = smov 0   ;;  %s1340_s21 = smov 0  }
   0x3 LB: > { %s1355_s22 = sadd.s32 4294967295, %s1298_s21   ;;  %s1058_s23 = sadd.s32 4294967294, %s1298_s21   ;;  %s1298_s21 = sphi %s1340_s21, %s1540_s21   ;;  %s1294_s20 = sphi %s1338_s20, %s1539_s20   ;;  %s1290_s19 = sphi %s1336_s19, %s1538_s19   ;;  %s1286_s18 = sphi %s1334_s18, %s1537_s18  }
   0x4   : > { %s1359_s24 = sadd.s32 1, %s1298_s21   ;;  %s150_s25 = sadd.s32 1, %s1294_s20 }
   0x5   : > { %s147_s26 = ssub.s32 %s1298_s21, %s1359_s24  ;;  %p160_p0 = scmp.ne.s32.totalorder %s1294_s20, %s1290_s19 }
   0x6   : > { %p148_p1 = scmp.eq.s32.totalorder %s147_s26, 0  ;;  %p161_p2 = scmp.eq.s32.totalorder %s1355_s22, 1 }
   0x7   : > { %p166_p3 = scmp.ne.s32.totalorder %s1290_s19, %s1286_s18  ;;  %p167_p4 = scmp.eq.s32.totalorder %s1058_s23, 1 }
   0x8   : > { %s1370_s27 = scalar_select %p148_p1, %s1294_s20, %s150_s25  }
   0x9   : > { %p1372_p5 = por %p161_p2, %p160_p0  ;;  %p1376_p6 = por %p167_p4, %p166_p3 }
   0xa   : > { %p1061_p7 = scmp.ge.s32.totalorder %s1298_s21, 1  ;;  %p215_p8 = scmp.lt.s32.totalorder %s1298_s21, 3 }
   0xc   : > { %p216_p9 = pnand %p1061_p7, %p215_p8 }
   0xd   : > { %s1300_s15 = smov (!%p216_p9), 120   ;;  %s1301_s7 = smov (!%p216_p9), 112  }
   0xe   : > { %219 = sbr.rel (%p216_p9) target bundleno = 815 (0x32f), region = 40  ;;  %p253_p10 = scmp.lt.s32.totalorder (!%p216_p9), %s1355_s22, 1 }
   0xf   : > { %s250_s6 = sand.u32 (!%p216_p9), 1, %s1290_s19   ;;  %s1256_s25 = scalar_lea.hbm (!%p216_p9), %s1534_s5, 64 }
  0x13   : > { %v383_v0 = vld [vmem:[%s1532_s3 + $0x58] sm:$0xff]  ;;  %v381_v2 = vld [vmem:[%s1532_s3 + $0x48] sm:$0xff]  ;;  %v382_v6 = vld [vmem:[%s1532_s3 + $0x50] sm:$0xff]  ;;  %s1440_s8 = scalar_select %p253_p10, %s1355_s22, 1  ;;  %vm288_vm0 = vcmask 261120   ;;  %vm702_vm1 = vcmask 64512  }
  0x14   : > { %v387_v1 = vld [vmem:[%s1532_s3 + $0x78] sm:$0xff]  ;;  %v385_v4 = vld [vmem:[%s1532_s3 + $0x68] sm:$0xff]  ;;  %344 = vmatpush.msra.mxu2 %v383_v0  ;;  %v386_v7 = vld [vmem:[%s1532_s3 + $0x70] sm:$0xff] }
  0x15   : > { %v1139_v3 = vpack.i.bf16 %v387_v1, %v383_v0  ;;  %364 = vmatpush.msra.mxu3 %v387_v1  ;;  %v1149_v5 = vpack.i.bf16 %v385_v4, %v381_v2  ;;  %v375_v8 = vld [vmem:[%s1532_s3 + $0x18] sm:$0xff]  ;;  %v380_v10 = vld [vmem:[%s1532_s3 + $0x40] sm:$0xff]  ;;  %v1144_v13 = vpack.i.bf16 %v386_v7, %v382_v6  ;;  %v374_v14 = vld [vmem:[%s1532_s3 + $0x10] sm:$0xff]  ;;  %s1443_s9 = sshll.u32 %s1440_s8, 3  ;;  %s267_s30 = scalar_lea.vmem %s1533_s4, %s1440_s8 }
  0x16   : > { %345 = vmatpush.msra.mxu2 %v382_v6  ;;  %v379_v9 = vld [vmem:[%s1532_s3 + $0x38] sm:$0xff]  ;;  %v384_v11 = vld [vmem:[%s1532_s3 + $0x60] sm:$0xff]  ;;  %304 = vmatpush.msra.mxu0 %v375_v8  ;;  %v378_v16 = vld [vmem:[%s1532_s3 + $0x30] sm:$0xff]  ;;  %s260_s14 = scalar_lea.vmem %s1530_s1, %s1443_s9  ;;  %s264_s23 = scalar_lea.vmem %s1531_s2, %s1443_s9 }
  0x17   : > { %1140 = vrot.lane.b32.xlu0 %v1139_v3, %s1300_s15  ;;  %1150 = vrot.lane.b32.xlu1 %v1149_v5, %s1300_s15  ;;  %v1159_v12 = vpack.i.bf16 %v379_v9, %v375_v8  ;;  %v1154_v15 = vpack.i.bf16 %v384_v11, %v380_v10  ;;  %v373_v17 = vld [vmem:[%s1532_s3 + $0x8] sm:$0xff]  ;;  %v372_v19 = vld [vmem:[%s1532_s3] sm:$0xff]  ;;  %v1164_v20 = vpack.i.bf16 %v378_v16, %v374_v14 }
  0x18   : > { %365 = vmatpush.msra.mxu3 %v386_v7  ;;  %346 = vmatpush.msra.mxu2 %v381_v2  ;;  %v377_v18 = vld [vmem:[%s1532_s3 + $0x28] sm:$0xff]  ;;  %v376_v21 = vld [vmem:[%s1532_s3 + $0x20] sm:$0xff] }
  0x19   : > { %324 = vmatpush.msra.mxu1 %v379_v9  ;;  %1160 = vrot.lane.b32.xlu2 %v1159_v12, %s1300_s15  ;;  %v1169_v22 = vpack.i.bf16 %v377_v18, %v373_v17  ;;  %v1174_v23 = vpack.i.bf16 %v376_v21, %v372_v19  ;;  %v270_v44 = vld [vmem:[%s260_s14] sm:$0xff]  ;;  %s948_s14 = scalar_lea.sflag [#allocation3], %s250_s6 }
  0x1a   : > { %366 = vmatpush.msra.mxu3 %v385_v4  ;;  %347 = vmatpush.msra.mxu2 %v380_v10  ;;  %v271_v10 = vld [vmem:[%s264_s23] sm:$0xff] }
  0x1b   : > { %305 = vmatpush.msra.mxu0 %v374_v14  ;;  %325 = vmatpush.msra.mxu1 %v378_v16 }
  0x1c   : > { %367 = vmatpush.msra.mxu3 %v384_v11 }
  0x1d   : > { %306 = vmatpush.msra.mxu0 %v373_v17  ;;  %326 = vmatpush.msra.mxu1 %v377_v18 }
  0x1f   : > { %1145 = vrot.lane.b32.xlu0 %v1144_v13, %s1300_s15  ;;  %1155 = vrot.lane.b32.xlu1 %v1154_v15, %s1300_s15 }
  0x20   : > { %307 = vmatpush.msra.mxu0 %v372_v19  ;;  %327 = vmatpush.msra.mxu1 %v376_v21 }
  0x21   : > { %1165 = vrot.lane.b32.xlu2 %v1164_v20, %s1300_s15 }
  0x27   : > { %1170 = vrot.lane.b32.xlu0 %v1169_v22, %s1300_s15  ;;  %1175 = vrot.lane.b32.xlu1 %v1174_v23, %s1300_s15  ;;  %s256_s15 = scalar_lea.vmem %s1529_s0, %s1443_s9  ;;  %s1095_s9 = sshll.u32 %s1355_s22, 5 }
  0x28   : > { %v269_v24 = vld [vmem:[%s256_s15] sm:$0xff]  ;;  %s959_s15 = scalar_lea.hbm %s1534_s5, %s1095_s9 }
  0x29   : > { %1180 = vrot.lane.b32.xlu2 %v1139_v3, %s1301_s7  ;;  %1068 = vmatmul.msk.f32.vlgmr.msra.gmra.mxu2 %vm288_vm0, %v269_v24  ;;  %s962_s13 = sshll.u32 %s959_s15, 4  ;;  %s963_s13 = int_to_ptr.hbm [resolvable:$true] %s962_s13 }
  0x2a   : > { %1069 = vmatmul.msk.f32.vlgmr.msra.gmra.mxu3 %vm288_vm0, %v269_v24  ;;  %1066 = vmatmul.msk.f32.vlgmr.msra.gmra.mxu0 %vm288_vm0, %v269_v24  ;;  %s1250_s22 = sshra.s32 %s963_s13, 4  ;;  %s1251_s22 = int_to_ptr.hbm [resolvable:$true] %s1250_s22 }
  0x2b   : > { %1067 = vmatmul.msk.f32.vlgmr.msra.gmra.mxu1 %vm288_vm0, %v269_v24  ;;  %s1252_s16 = scalar_lea.hbm %s1251_s22, 32  ;;  %p1257_p0 = scmp.lt.s32.totalorder %s1251_s22, %s1534_s5 }
  0x2c   : > { %p1253_p11 = scmp.ne.s32.totalorder %s1251_s22, %s1252_s16  ;;  %p1258_p1 = scmp.lt.s32.totalorder %s1256_s25, %s1252_s16 }
  0x2e   : > { %p1254_p12 = pnand %p1253_p11, %p1372_p5  ;;  %p1259_p2 = por %p1258_p1, %p1257_p0 }
  0x2f   : > { %1185 = vrot.lane.b32.xlu0 %v1144_v13, %s1301_s7  ;;  %1190 = vrot.lane.b32.xlu1 %v1149_v5, %s1301_s7 }
  0x30   : > { %p1255_p13 = pneg %p1254_p12 }
  0x31   : > { %1195 = vrot.lane.b32.xlu2 %v1154_v15, %s1301_s7 }
  0x32   : > { %p1260_p3 = pnand %p1259_p2, %p1255_p13 }
  0x37   : > { %1200 = vrot.lane.b32.xlu0 %v1159_v12, %s1301_s7  ;;  %1205 = vrot.lane.b32.xlu1 %v1164_v20, %s1301_s7 }
  0x39   : > { %1210 = vrot.lane.b32.xlu2 %v1169_v22, %s1301_s7 }
  0x3f   : > { %1215 = vrot.lane.b32.xlu0 %v1174_v23, %s1301_s7  ;;  %v1219_v23 = vld [vmem:[%s267_s30] ss:$0 sm:$0xff]  ;;  %s1062_s7 = sshll.u32 %s250_s6, 5 }
  0x40   : > { %s252_s8 = scalar_lea.vmem [#allocation2], %s1062_s7 }
  0x41   : > { %s960_s12 = sshll.u32 %s252_s8, 4  ;;  %s961_s12 = int_to_ptr.vmem [resolvable:$true] %s960_s12 }
  0x73   : > { %v1161_v25 = vpop.permute.xlu2 %1160 }
  0x74   : > { %v1162_v26 = vunpack.i.l.bf16 %v1161_v25  ;;  %v1163_v27 = vunpack.i.h.bf16 %v1161_v25 }
  0x76   : > { %419 = vmatpush.msrb.mxu0 %v1162_v26  ;;  %455 = vmatpush.msrb.mxu1 %v1163_v27 }
  0x7b   : > { %v1166_v28 = vpop.permute.xlu2 %1165 }
  0x7c   : > { %v1167_v29 = vunpack.i.l.bf16 %v1166_v28  ;;  %v1168_v30 = vunpack.i.h.bf16 %v1166_v28 }
  0x7e   : > { %420 = vmatpush.msrb.mxu0 %v1167_v29  ;;  %456 = vmatpush.msrb.mxu1 %v1168_v30 }
  0x83   : > { %v1181_v43 = vpop.permute.xlu2 %1180 }
  0x84   : > { %v1183_v45 = vunpack.i.h.bf16 %v1181_v43  ;;  %v1182_v46 = vunpack.i.l.bf16 %v1181_v43 }
  0x89   : > { %v1141_v31 = vpop.permute.xlu0 %1140  ;;  %v1151_v32 = vpop.permute.xlu1 %1150 }
  0x8a   : > { %v1142_v33 = vunpack.i.l.bf16 %v1141_v31  ;;  %v1143_v34 = vunpack.i.h.bf16 %v1141_v31  ;;  %v1152_v39 = vunpack.i.l.bf16 %v1151_v32  ;;  %v1153_v40 = vunpack.i.h.bf16 %v1151_v32 }
  0x8b   : > { %v1196_v53 = vpop.permute.xlu2 %1195 }
  0x8c   : > { %491 = vmatpush.msrb.mxu2 %v1142_v33  ;;  %527 = vmatpush.msrb.mxu3 %v1143_v34  ;;  %v1198_v60 = vunpack.i.h.bf16 %v1196_v53  ;;  %v1197_v61 = vunpack.i.l.bf16 %v1196_v53 }
  0x91   : > { %v1146_v35 = vpop.permute.xlu0 %1145  ;;  %v1156_v36 = vpop.permute.xlu1 %1155 }
  0x92   : > { %v1147_v37 = vunpack.i.l.bf16 %v1146_v35  ;;  %v1148_v38 = vunpack.i.h.bf16 %v1146_v35  ;;  %v1157_v41 = vunpack.i.l.bf16 %v1156_v36  ;;  %v1158_v42 = vunpack.i.h.bf16 %v1156_v36 }
  0x93   : > { %v1211_v63 = vpop.permute.xlu2 %1210 }
  0x94   : > { %492 = vmatpush.msrb.mxu2 %v1147_v37  ;;  %528 = vmatpush.msrb.mxu3 %v1148_v38  ;;  %v1213_v5 = vunpack.i.h.bf16 %v1211_v63  ;;  %v1212_v6 = vunpack.i.l.bf16 %v1211_v63 }
  0x96   : > { %493 = vmatpush.msrb.mxu2 %v1152_v39  ;;  %529 = vmatpush.msrb.mxu3 %v1153_v40 }
  0x98   : > { %494 = vmatpush.msrb.mxu2 %v1157_v41  ;;  %530 = vmatpush.msrb.mxu3 %v1158_v42 }
  0x99   : > { %v1171_v47 = vpop.permute.xlu0 %1170  ;;  %1072 = vmatmul.msk.f32.vlgmr.msrb.gmra.mxu2 %vm288_vm0, %v270_v44  ;;  %1073 = vmatmul.msk.f32.vlgmr.msrb.gmra.mxu3 %vm288_vm0, %v270_v44  ;;  %v1176_v48 = vpop.permute.xlu1 %1175 }
  0x9a   : > { %v1172_v49 = vunpack.i.l.bf16 %v1171_v47  ;;  %v1173_v50 = vunpack.i.h.bf16 %v1171_v47  ;;  %654 = vmatpush.msra.mxu2 %v1182_v46  ;;  %690 = vmatpush.msra.mxu3 %v1183_v45  ;;  %v1177_v51 = vunpack.i.l.bf16 %v1176_v48  ;;  %v1178_v52 = vunpack.i.h.bf16 %v1176_v48 }
  0x9c   : > { %421 = vmatpush.msrb.mxu0 %v1172_v49  ;;  %457 = vmatpush.msrb.mxu1 %v1173_v50 }
  0x9e   : > { %422 = vmatpush.msrb.mxu0 %v1177_v51  ;;  %458 = vmatpush.msrb.mxu1 %v1178_v52 }
  0x9f   : > { %1070 = vmatmul.msk.f32.vlgmr.msrb.gmra.mxu0 %vm288_vm0, %v270_v44  ;;  %1071 = vmatmul.msk.f32.vlgmr.msrb.gmra.mxu1 %vm288_vm0, %v270_v44 }
  0xa1   : > { %v1186_v54 = vpop.permute.xlu0 %1185  ;;  %v1191_v57 = vpop.permute.xlu1 %1190 }
  0xa2   : > { %v1188_v55 = vunpack.i.h.bf16 %v1186_v54  ;;  %v1187_v56 = vunpack.i.l.bf16 %v1186_v54  ;;  %v1193_v58 = vunpack.i.h.bf16 %v1191_v57  ;;  %v1192_v59 = vunpack.i.l.bf16 %v1191_v57 }
  0xa4   : > { %655 = vmatpush.msra.mxu2 %v1187_v56  ;;  %691 = vmatpush.msra.mxu3 %v1188_v55 }
  0xa6   : > { %656 = vmatpush.msra.mxu2 %v1192_v59  ;;  %692 = vmatpush.msra.mxu3 %v1193_v58 }
  0xa7   : > { %v309_v11 = vpop.f32.mrf.mxu0 }
  0xa8   : > { %657 = vmatpush.msra.mxu2 %v1197_v61  ;;  %693 = vmatpush.msra.mxu3 %v1198_v60  ;;  %v329_v14 = vpop.f32.mrf.mxu1 }
  0xa9   : > { %v1201_v62 = vpop.permute.xlu0 %1200  ;;  %v1206_v2 = vpop.permute.xlu1 %1205  ;;  %1076 = vmatmul.msk.f32.vlgmr.msra.gmra.mxu2 %vm288_vm0, %v271_v10  ;;  %1077 = vmatmul.msk.f32.vlgmr.msra.gmra.mxu3 %vm288_vm0, %v271_v10 }
  0xaa   : > { %v1203_v0 = vunpack.i.h.bf16 %v1201_v62  ;;  %v1202_v1 = vunpack.i.l.bf16 %v1201_v62  ;;  %v1208_v3 = vunpack.i.h.bf16 %v1206_v2  ;;  %v1207_v4 = vunpack.i.l.bf16 %v1206_v2 }
  0xac   : > { %582 = vmatpush.msra.mxu0 %v1202_v1  ;;  %618 = vmatpush.msra.mxu1 %v1203_v0  ;;  %v349_v12 = vpop.f32.mrf.mxu2 }
  0xad   : > { %v369_v13 = vpop.f32.mrf.mxu3 }
  0xae   : > { %583 = vmatpush.msra.mxu0 %v1207_v4  ;;  %619 = vmatpush.msra.mxu1 %v1208_v3 }
  0xb0   : > { %584 = vmatpush.msra.mxu0 %v1212_v6  ;;  %620 = vmatpush.msra.mxu1 %v1213_v5 }
  0xb1   : > { %v1216_v7 = vpop.permute.xlu0 %1215 }
  0xb2   : > { %v1218_v8 = vunpack.i.h.bf16 %v1216_v7  ;;  %v1217_v9 = vunpack.i.l.bf16 %v1216_v7 }
  0xb4   : > { %585 = vmatpush.msra.mxu0 %v1217_v9  ;;  %621 = vmatpush.msra.mxu1 %v1218_v8 }
  0xb5   : > { %1074 = vmatmul.msk.f32.vlgmr.msra.gmra.mxu0 %vm288_vm0, %v271_v10  ;;  %1075 = vmatmul.msk.f32.vlgmr.msra.gmra.mxu1 %vm288_vm0, %v271_v10 }
 0x11c   : > { %v424_v15 = vpop.f32.mrf.mxu0  ;;  %v496_v16 = vpop.f32.mrf.mxu2 }
 0x11d   : > { %v532_v17 = vpop.f32.mrf.mxu3  ;;  %1078 = vmatpush.xpose.msk.msrb.mxu0 %vm702_vm1, %v424_v15  ;;  %1082 = vmatpush.xpose.msk.msrb.mxu2 %vm702_vm1, %v496_v16  ;;  %v460_v18 = vpop.f32.mrf.mxu1 }
 0x11e   : > { %1084 = vmatpush.xpose.msk.msrb.mxu3 %vm702_vm1, %v532_v17  ;;  %1080 = vmatpush.xpose.msk.msrb.mxu1 %vm702_vm1, %v460_v18 }
 0x120   : > { %1079 = vmatmul.msk.f32.vlgmr.msrb.gmra.mxu0 %vm702_vm1, %v309_v11  ;;  %1083 = vmatmul.msk.f32.vlgmr.msrb.gmra.mxu2 %vm702_vm1, %v349_v12 }
 0x121   : > { %1085 = vmatmul.msk.f32.vlgmr.msrb.gmra.mxu3 %vm702_vm1, %v369_v13  ;;  %1081 = vmatmul.msk.f32.vlgmr.msrb.gmra.mxu1 %vm702_vm1, %v329_v14 }
 0x12c   : > { %v659_v21 = vpop.f32.mrf.mxu2  ;;  %v695_v22 = vpop.f32.mrf.mxu3 }
 0x12d   : > { %915 = vmatpush.msra.mxu2 %v659_v21  ;;  %938 = vmatpush.msra.mxu3 %v695_v22 }
 0x132   : > { %v587_v19 = vpop.f32.mrf.mxu0  ;;  %v623_v20 = vpop.f32.mrf.mxu1 }
 0x133   : > { %869 = vmatpush.msra.mxu0 %v587_v19  ;;  %892 = vmatpush.msra.mxu1 %v623_v20 }
 0x19d   : > { %v726_v24 = vpop.f32.mrf.mxu0 }
 0x19e   : > { %v727_v25 = vadd.f32 %v1219_v23, %v726_v24  ;;  %v752_v33 = vpop.f32.mrf.mxu1 }
 0x19f   : > { %v753_v34 = vadd.f32 %v1219_v23, %v752_v33 }
 0x1a0   : > { %v807_v26 = vsel %vm702_vm1, %v727_v25, -inf }
 0x1a1   : > { %808 = vmax.xlane.f32.xlu0 %v807_v26  ;;  %v810_v35 = vsel %vm702_vm1, %v753_v34, -inf }
 0x1a3   : > { %v778_v27 = vpop.f32.mrf.mxu2 }
 0x1a4   : > { %v779_v28 = vadd.f32 %v1219_v23, %v778_v27  ;;  %v804_v29 = vpop.f32.mrf.mxu3 }
 0x1a5   : > { %v805_v30 = vadd.f32 %v1219_v23, %v804_v29 }
 0x1a6   : > { %v813_v31 = vsel %vm702_vm1, %v779_v28, -inf }
 0x1a7   : > { %v816_v32 = vsel %vm702_vm1, %v805_v30, -inf  ;;  %814 = vmax.xlane.f32.xlu1 %v813_v31 }
 0x1a8   : > { %817 = vmax.xlane.f32.xlu2 %v816_v32 }
 0x1b0   : > { %811 = vmax.xlane.f32.xlu2 %v810_v35 }
 0x214   : > { %v809_v36 = vpop.xlane.xlu0 %808 }
 0x215   : > { %v819_v37 = vsub.f32 %v727_v25, %v809_v36 }
 0x217   : > { %v823_v38 = vmul.f32 1.442695, %v819_v37 }
 0x219   : > { %1220 = vpow2.f32 %v823_v38 }
 0x21a   : > { %v815_v39 = vpop.xlane.xlu1 %814 }
 0x21b   : > { %v818_v40 = vpop.xlane.xlu2 %817  ;;  %v821_v41 = vsub.f32 %v779_v28, %v815_v39 }
 0x21c   : > { %v822_v42 = vsub.f32 %v805_v30, %v818_v40 }
 0x21d   : > { %v827_v43 = vmul.f32 1.442695, %v821_v41 }
 0x21e   : > { %v829_v44 = vmul.f32 1.442695, %v822_v42 }
 0x21f   : > { %v1221_v45 = vpop.eup %1220  ;;  %1222 = vpow2.f32 %v827_v43 }
 0x220   : > { %1224 = vpow2.f32 %v829_v44  ;;  %v831_v46 = vsel %vm702_vm1, %v1221_v45, 0.0 }
 0x221   : > { %832 = vadd.xlane.f32.xlu0 %v831_v46 }
 0x223   : > { %v812_v47 = vpop.xlane.xlu2 %811 }
 0x224   : > { %v820_v48 = vsub.f32 %v753_v34, %v812_v47 }
 0x225   : > { %v1223_v49 = vpop.eup %1222 }
 0x226   : > { %v1225_v50 = vpop.eup %1224  ;;  %v825_v51 = vmul.f32 1.442695, %v820_v48  ;;  %v837_v52 = vsel %vm702_vm1, %v1223_v49, 0.0 }
 0x227   : > { %838 = vadd.xlane.f32.xlu1 %v837_v52  ;;  %v840_v53 = vsel %vm702_vm1, %v1225_v50, 0.0 }
 0x228   : > { %1226 = vpow2.f32 %v825_v51  ;;  %841 = vadd.xlane.f32.xlu2 %v840_v53 }
 0x22e   : > { %v1227_v54 = vpop.eup %1226 }
 0x22f   : > { %v834_v55 = vsel %vm702_vm1, %v1227_v54, 0.0 }
 0x230   : > { %835 = vadd.xlane.f32.xlu1 %v834_v55 }
 0x294   : > { %v833_v56 = vpop.xlane.xlu0 %832 }
 0x295   : > { %1228 = vrcp.f32 %v833_v56 }
 0x29a   : > { %v839_v57 = vpop.xlane.xlu1 %838 }
 0x29b   : > { %v1229_v58 = vpop.eup %1228  ;;  %1230 = vrcp.f32 %v839_v57  ;;  %v842_v59 = vpop.xlane.xlu2 %841 }
 0x29c   : > { %v847_v60 = vmul.f32 %v1229_v58, %v1221_v45  ;;  %1232 = vrcp.f32 %v842_v59 }
 0x29e   : > { %1086 = vmatmul.msk.f32.vlgmr.msra.gmra.mxu0 %vm702_vm1, %v847_v60 }
 0x2a1   : > { %v1231_v61 = vpop.eup %1230 }
 0x2a2   : > { %v1233_v62 = vpop.eup %1232  ;;  %v849_v63 = vmul.f32 %v1231_v61, %v1223_v49 }
 0x2a3   : > { %v850_v0 = vmul.f32 %v1233_v62, %v1225_v50  ;;  %v836_v1 = vpop.xlane.xlu1 %835 }
 0x2a4   : > { %1234 = vrcp.f32 %v836_v1  ;;  %1088 = vmatmul.msk.f32.vlgmr.msra.gmra.mxu2 %vm702_vm1, %v849_v63 }
 0x2a5   : > { %1089 = vmatmul.msk.f32.vlgmr.msra.gmra.mxu3 %vm702_vm1, %v850_v0 }
 0x2aa   : > { %v1235_v2 = vpop.eup %1234 }
 0x2ab   : > { %v848_v3 = vmul.f32 %v1235_v2, %v1227_v54 }
 0x2ad   : > { %1087 = vmatmul.msk.f32.vlgmr.msra.gmra.mxu1 %vm702_vm1, %v848_v3 }
 0x31b   : > { %v871_v4 = vpop.f32.mrf.mxu0 }
 0x31c   : > { %943 = vst.msk [vmem:[%s252_s8] sm:$0xff] %vm702_vm1, %v871_v4 }
 0x327   : > { %v917_v5 = vpop.f32.mrf.mxu2 }
 0x328   : > { %945 = vst.msk [vmem:[%s252_s8 + $0x10] sm:$0xff] %vm702_vm1, %v917_v5  ;;  %v940_v6 = vpop.f32.mrf.mxu3 }
 0x329   : > { %946 = vst.msk [vmem:[%s252_s8 + $0x18] sm:$0xff] %vm702_vm1, %v940_v6 }
 0x32a   : > { %v894_v7 = vpop.f32.mrf.mxu1 }
 0x32b   : > { %944 = vst.msk [vmem:[%s252_s8 + $0x8] sm:$0xff] %vm702_vm1, %v894_v7 }
 0x32c   : > { %1263 = shalt.err (!%p1260_p3)
}
 0x32d   : > { %s1302_s6 = smov 128   ;;  %s1303_s7 = smov 8  }
 0x32e   : > { %1096 = dma.vmem_to_hbm [thread:$0]  (%p1372_p5), %s961_s12, 512, %s963_s13, %s948_s14, %s1302_s6, %s1302_s6, %s1303_s7  }
 0x32f PF: > { %p1102_p4 = scmp.ge.s32.totalorder %s1298_s21, 2  ;;  %s977_s8 = sand.u32 1, %s1286_s18  }
 0x330   : > { %s978_s9 = scalar_lea.sflag [#allocation3], %s977_s8 }
 0x331   : > { %p1099_p7 = pnand %p1102_p4, %p1376_p6 }
 0x333   : > { %p1100_p8 = pneg %p1099_p7 }
 0x335   : > { %1281 = dma.done.wait (%p1100_p8), %s978_s9, 512  }
 0x336   : > { %1283 = vsyncadd (%p1100_p8), %s978_s9, 4294966784  ;;  %p15_p9 = scmp.ge.s32.totalorder %s1359_s24, 4   ;;  %s1537_s18 = smov %s1290_s19 }
 0x337   : > { %s1538_s19 = smov %s1294_s20  ;;  %s1539_s20 = smov %s1370_s27 }
 0x338   : > { %s1540_s21 = smov %s1359_s24  ;;  %17 = sbr.rel (!%p15_p9) target bundleno = 3 (0x3), region = 84 }
 0x33d   :  { %984 = vsyncpa [#allocation3], 1 }
 0x33e   :  { %986 = vsyncpa [#allocation3 + $0x1], 1 }

</bundles_post_ra>
